<compile_context>
chip_gen: v6e
topology: v6e:2x2x1
jax: 0.10.0
libtpu: 0.0.40
codegen_flags: <defaults>
</compile_context>

<pallas_src>
import math

import jax
import jax.numpy as jnp
from jax.experimental import pallas as pl
from jax.experimental.pallas import tpu as pltpu


def _round_up(x: int, m: int) -> int:
    return ((x + m - 1) // m) * m


def _make_gather_kernel(scale: float, tn: int):
    def kernel(ids_ref, emb_hbm, out_ref, buf, sem):
        # ids_ref : (n_pad,)        int32  SMEM (scalar prefetch) — token ids
        # emb_hbm : (V, D_pad)      table  HBM  (memory_space=pl.ANY)
        # out_ref : (tn, D_pad)            VMEM output tile
        # buf     : (2, tn, D_pad)         VMEM double-buffered gather scratch
        # sem     : (2, tn)                DMA semaphores (one per row copy)
        t = pl.program_id(0)
        slot = t % 2

        def start_fetch(tile, which):
            base = tile * tn

            @pl.loop(0, tn)
            def _(r):
                row = ids_ref[base + r]
                pltpu.make_async_copy(
                    emb_hbm.at[row], buf.at[which, r], sem.at[which, r]
                ).start()

        def wait_fetch(which):
            @pl.loop(0, tn)
            def _(r):
                # Dummy src of matching shape; the wait only needs dst + sem.
                pltpu.make_async_copy(
                    emb_hbm.at[0], buf.at[which, r], sem.at[which, r]
                ).wait()

        # Prime the pipeline: fetch tile 0 into slot 0 on the first step.
        @pl.when(t == 0)
        def _():
            start_fetch(0, 0)

        # Prefetch the next token tile into the other slot so its HBM reads
        # overlap this tile's wait/compute and output writeback.
        @pl.when(t + 1 < pl.num_programs(0))
        def _():
            start_fetch(t + 1, 1 - slot)

        wait_fetch(slot)
        out_ref[...] = (buf[slot] * scale).astype(out_ref.dtype)

    return kernel


def input_embeddings_forward(x, emb_table, *, token_tile: int = 256):
    """Pallas equivalent of InputEmbeddings.forward.

    x:         (batch, seq) int token ids
    emb_table: (data_size, d_model) embedding weights
    returns:   (batch, seq, d_model), same dtype as emb_table
    """
    batch, seq = x.shape
    vocab, d_model = emb_table.shape
    scale = math.sqrt(d_model)
    dtype = emb_table.dtype

    # Lane-dense output: pad d_model up to a multiple of 128.  Real
    # transformer widths (256/512/1024/...) already satisfy this -> no-op.
    d_pad = _round_up(d_model, 128)
    if d_pad != d_model:
        emb_table = jnp.pad(emb_table, ((0, 0), (0, d_pad - d_model)))

    # Flatten, clamp (PyTorch nn.Embedding raises on OOB ids; we clamp so the
    # DMA never reads out of bounds), and pad to a multiple of the token tile.
    n_tokens = batch * seq
    ids = jnp.clip(x.reshape(n_tokens).astype(jnp.int32), 0, vocab - 1)
    tn = min(_round_up(token_tile, 8), _round_up(n_tokens, 8))
    n_pad = _round_up(n_tokens, tn)
    if n_pad != n_tokens:
        ids = jnp.pad(ids, (0, n_pad - n_tokens))  # pad tokens gather row 0

    n_tiles = n_pad // tn

    out_flat = pl.pallas_call(
        _make_gather_kernel(scale, tn),
        out_shape=jax.ShapeDtypeStruct((n_pad, d_pad), dtype),
        grid_spec=pltpu.PrefetchScalarGridSpec(
            num_scalar_prefetch=1,  # ids -> SMEM, available to the kernel body
            grid=(n_tiles,),
            in_specs=[
                # Embedding table stays in HBM; rows are gathered manually.
                pl.BlockSpec(memory_space=pl.ANY),
            ],
            out_specs=pl.BlockSpec((tn, d_pad), lambda t, ids: (t, 0)),
            scratch_shapes=[
                pltpu.VMEM((2, tn, d_pad), dtype),
                pltpu.SemaphoreType.DMA((2, tn)),
            ],
        ),
        compiler_params=pltpu.CompilerParams(
            # Scratch buffers / semaphores carry state across grid steps
            # (cross-step double buffering), so the axis must run sequentially.
            dimension_semantics=("arbitrary",),
        ),
    )(ids, emb_table)

    return out_flat[:n_tokens, :d_model].reshape(batch, seq, d_model)


if __name__ == "__main__":
    # Small shapes consistent with the module: d_model=32, data_size=64,
    # batch=2, seq=8.
    d_model = 32
    data_size = 64
    batch, seq = 2, 8

    key = jax.random.PRNGKey(0)
    k_emb, k_idx = jax.random.split(key)

    # nn.Embedding initializes its weight ~ N(0, 1); do the same deterministically.
    emb_table = jax.random.normal(k_emb, (data_size, d_model), dtype=jnp.float32)
    x = jax.random.randint(k_idx, (batch, seq), 0, data_size, dtype=jnp.int32)

    out = input_embeddings_forward(x, emb_table)
    out = jax.block_until_ready(out)

    ref = emb_table[x] * math.sqrt(d_model)
    assert out.shape == (batch, seq, d_model)
    assert out.dtype == jnp.float32
    assert jnp.allclose(out, ref, atol=1e-5, rtol=1e-5)

    # Second check: multi-tile grid (exercises double buffering) + ragged
    # token count (exercises the padding path) with a small token tile.
    batch2, seq2 = 2, 20  # 40 tokens, tile=16 -> 3 grid steps, 8 pad tokens
    x2 = jax.random.randint(jax.random.PRNGKey(1), (batch2, seq2), 0,
                            data_size, dtype=jnp.int32)
    out2 = jax.block_until_ready(
        input_embeddings_forward(x2, emb_table, token_tile=16))
    ref2 = emb_table[x2] * math.sqrt(d_model)
    assert jnp.allclose(out2, ref2, atol=1e-5, rtol=1e-5)

    print("KERNEL_OK")
</pallas_src>

<mosaic_0001>
module attributes {stable_mosaic.version = 11 : i64} {
  func.func @kernel(%arg0: i32, %arg1: memref<16xi32, #tpu.memory_space<smem>>, %arg2: memref<64x128xf32, #tpu.memory_space<any>>, %arg3: memref<16x128xf32, #tpu.memory_space<vmem>>, %arg4: memref<2x16x128xf32, #tpu.memory_space<vmem>>, %arg5: memref<2x16x!tpu.dma_semaphore, #tpu.memory_space<semaphore_mem>>) attributes {dimension_semantics = [#tpu.dimension_semantics<arbitrary>], iteration_bounds = array<i64: 1>, scalar_prefetch = 1 : i64, scratch_operands = 2 : i64, tpu.core_type = #tpu.core_type<tc>, window_params = [{}, {transform_indices = @transform_1, window_bounds = array<i64: 16, 128>}]} {
    %c2_i32 = arith.constant 2 : i32
    %c0_i32 = arith.constant 0 : i32
    %0 = arith.cmpi eq, %c2_i32, %c0_i32 : i32
    %c1_i32 = arith.constant 1 : i32
    %1 = arith.select %0, %c1_i32, %c2_i32 : i32
    %2 = arith.remsi %arg0, %1 : i32
    %c0_i32_0 = arith.constant 0 : i32
    %3 = arith.cmpi ne, %2, %c0_i32_0 : i32
    %c0_i32_1 = arith.constant 0 : i32
    %4 = arith.cmpi slt, %2, %c0_i32_1 : i32
    %c0_i32_2 = arith.constant 0 : i32
    %5 = arith.cmpi slt, %1, %c0_i32_2 : i32
    %6 = arith.xori %4, %5 : i1
    %7 = arith.andi %6, %3 : i1
    %8 = arith.addi %2, %1 : i32
    %9 = arith.select %7, %8, %2 : i32
    %c0_i32_3 = arith.constant 0 : i32
    %10 = arith.cmpi eq, %arg0, %c0_i32_3 : i32
    %11 = arith.extui %10 : i1 to i32
    %c0_i32_4 = arith.constant 0 : i32
    %12 = arith.cmpi ne, %11, %c0_i32_4 : i32
    scf.if %12 {
      %c0_i32_14 = arith.constant 0 : i32
      %c16_i32_15 = arith.constant 16 : i32
      %24 = arith.addi %c0_i32_14, %c16_i32_15 : i32
      %c1_i32_16 = arith.constant 1 : i32
      scf.for %arg6 = %c0_i32_14 to %24 step %c1_i32_16  : i32 {
        %c1_i32_18 = arith.constant 1 : i32
        %25 = arith.muli %arg6, %c1_i32_18 : i32
        %c0_i32_19 = arith.constant 0 : i32
        %26 = arith.addi %c0_i32_19, %25 : i32
        %c0_i32_20 = arith.constant 0 : i32
        %27 = arith.addi %c0_i32_20, %26 : i32
        %28 = arith.index_cast %27 : i32 to index
        %29 = memref.load %arg1[%28] : memref<16xi32, #tpu.memory_space<smem>>
        %c0_i32_21 = arith.constant 0 : i32
        %c0_i32_22 = arith.constant 0 : i32
        %c0_i32_23 = arith.constant 0 : i32
        %30 = tpu.memref_slice %arg2[%29, %c0_i32_23] : memref<64x128xf32, #tpu.memory_space<any>> -> memref<1x128xf32, #tpu.memory_space<any>>
        %31 = tpu.memref_squeeze %30 : memref<1x128xf32, #tpu.memory_space<any>> -> memref<128xf32, #tpu.memory_space<any>>
        %c0_i32_24 = arith.constant 0 : i32
        %32 = tpu.memref_slice %arg4[%c0_i32_21, %26, %c0_i32_24] : memref<2x16x128xf32, #tpu.memory_space<vmem>> -> memref<1x1x128xf32, #tpu.memory_space<vmem>>
        %33 = tpu.memref_squeeze %32 : memref<1x1x128xf32, #tpu.memory_space<vmem>> -> memref<128xf32, #tpu.memory_space<vmem>>
        %34 = tpu.memref_slice %arg5[%c0_i32_22, %26] : memref<2x16x!tpu.dma_semaphore, #tpu.memory_space<semaphore_mem>> -> memref<1x1x!tpu.dma_semaphore, #tpu.memory_space<semaphore_mem>>
        %35 = tpu.memref_squeeze %34 : memref<1x1x!tpu.dma_semaphore, #tpu.memory_space<semaphore_mem>> -> memref<!tpu.dma_semaphore, #tpu.memory_space<semaphore_mem>>
        tpu.enqueue_dma source(%31 : memref<128xf32, #tpu.memory_space<any>>) target(%33 : memref<128xf32, #tpu.memory_space<vmem>>) target_semaphore(%35 : memref<!tpu.dma_semaphore, #tpu.memory_space<semaphore_mem>>)
      }
      %c16_i32_17 = arith.constant 16 : i32
    } else {
    }
    %c1_i32_5 = arith.constant 1 : i32
    %13 = arith.addi %arg0, %c1_i32_5 : i32
    %c1_i32_6 = arith.constant 1 : i32
    %14 = arith.cmpi slt, %13, %c1_i32_6 : i32
    %15 = arith.extui %14 : i1 to i32
    %c0_i32_7 = arith.constant 0 : i32
    %16 = arith.cmpi ne, %15, %c0_i32_7 : i32
    scf.if %16 {
      %c1_i32_14 = arith.constant 1 : i32
      %24 = arith.addi %arg0, %c1_i32_14 : i32
      %c1_i32_15 = arith.constant 1 : i32
      %25 = arith.subi %c1_i32_15, %9 : i32
      %c16_i32_16 = arith.constant 16 : i32
      %26 = arith.muli %24, %c16_i32_16 : i32
      %c0_i32_17 = arith.constant 0 : i32
      %c16_i32_18 = arith.constant 16 : i32
      %27 = arith.addi %c0_i32_17, %c16_i32_18 : i32
      %c1_i32_19 = arith.constant 1 : i32
      scf.for %arg6 = %c0_i32_17 to %27 step %c1_i32_19  : i32 {
        %c1_i32_21 = arith.constant 1 : i32
        %28 = arith.muli %arg6, %c1_i32_21 : i32
        %c0_i32_22 = arith.constant 0 : i32
        %29 = arith.addi %c0_i32_22, %28 : i32
        %30 = arith.addi %26, %29 : i32
        %31 = arith.index_cast %30 : i32 to index
        %32 = memref.load %arg1[%31] : memref<16xi32, #tpu.memory_space<smem>>
        %c0_i32_23 = arith.constant 0 : i32
        %33 = tpu.memref_slice %arg2[%32, %c0_i32_23] : memref<64x128xf32, #tpu.memory_space<any>> -> memref<1x128xf32, #tpu.memory_space<any>>
        %34 = tpu.memref_squeeze %33 : memref<1x128xf32, #tpu.memory_space<any>> -> memref<128xf32, #tpu.memory_space<any>>
        %c0_i32_24 = arith.constant 0 : i32
        %35 = tpu.memref_slice %arg4[%25, %29, %c0_i32_24] : memref<2x16x128xf32, #tpu.memory_space<vmem>> -> memref<1x1x128xf32, #tpu.memory_space<vmem>>
        %36 = tpu.memref_squeeze %35 : memref<1x1x128xf32, #tpu.memory_space<vmem>> -> memref<128xf32, #tpu.memory_space<vmem>>
        %37 = tpu.memref_slice %arg5[%25, %29] : memref<2x16x!tpu.dma_semaphore, #tpu.memory_space<semaphore_mem>> -> memref<1x1x!tpu.dma_semaphore, #tpu.memory_space<semaphore_mem>>
        %38 = tpu.memref_squeeze %37 : memref<1x1x!tpu.dma_semaphore, #tpu.memory_space<semaphore_mem>> -> memref<!tpu.dma_semaphore, #tpu.memory_space<semaphore_mem>>
        tpu.enqueue_dma source(%34 : memref<128xf32, #tpu.memory_space<any>>) target(%36 : memref<128xf32, #tpu.memory_space<vmem>>) target_semaphore(%38 : memref<!tpu.dma_semaphore, #tpu.memory_space<semaphore_mem>>)
      }
      %c16_i32_20 = arith.constant 16 : i32
    } else {
    }
    %c0_i32_8 = arith.constant 0 : i32
    %c16_i32 = arith.constant 16 : i32
    %17 = arith.addi %c0_i32_8, %c16_i32 : i32
    %c1_i32_9 = arith.constant 1 : i32
    scf.for %arg6 = %c0_i32_8 to %17 step %c1_i32_9  : i32 {
      %c1_i32_14 = arith.constant 1 : i32
      %24 = arith.muli %arg6, %c1_i32_14 : i32
      %c0_i32_15 = arith.constant 0 : i32
      %25 = arith.addi %c0_i32_15, %24 : i32
      %c0_i32_16 = arith.constant 0 : i32
      %c0_i32_17 = arith.constant 0 : i32
      %26 = tpu.memref_slice %arg2[%c0_i32_16, %c0_i32_17] : memref<64x128xf32, #tpu.memory_space<any>> -> memref<1x128xf32, #tpu.memory_space<any>>
      %27 = tpu.memref_squeeze %26 : memref<1x128xf32, #tpu.memory_space<any>> -> memref<128xf32, #tpu.memory_space<any>>
      %c0_i32_18 = arith.constant 0 : i32
      %28 = tpu.memref_slice %arg4[%9, %25, %c0_i32_18] : memref<2x16x128xf32, #tpu.memory_space<vmem>> -> memref<1x1x128xf32, #tpu.memory_space<vmem>>
      %29 = tpu.memref_squeeze %28 : memref<1x1x128xf32, #tpu.memory_space<vmem>> -> memref<128xf32, #tpu.memory_space<vmem>>
      %30 = tpu.memref_slice %arg5[%9, %25] : memref<2x16x!tpu.dma_semaphore, #tpu.memory_space<semaphore_mem>> -> memref<1x1x!tpu.dma_semaphore, #tpu.memory_space<semaphore_mem>>
      %31 = tpu.memref_squeeze %30 : memref<1x1x!tpu.dma_semaphore, #tpu.memory_space<semaphore_mem>> -> memref<!tpu.dma_semaphore, #tpu.memory_space<semaphore_mem>>
      tpu.wait_dma2 semaphore(%31 : memref<!tpu.dma_semaphore, #tpu.memory_space<semaphore_mem>>) src(%27 : memref<128xf32, #tpu.memory_space<any>>) dst(%29 : memref<128xf32, #tpu.memory_space<vmem>>)
    }
    %c16_i32_10 = arith.constant 16 : i32
    %18 = arith.index_cast %9 : i32 to index
    %c0 = arith.constant 0 : index
    %c0_11 = arith.constant 0 : index
    %19 = vector.load %arg4[%18, %c0, %c0_11] : memref<2x16x128xf32, #tpu.memory_space<vmem>>, vector<1x16x128xf32>
    %20 = vector.shape_cast %19 : vector<1x16x128xf32> to vector<16x128xf32>
    %cst = arith.constant 5.65685415 : f32
    %21 = vector.broadcast %cst : f32 to vector<16x128xf32>
    %22 = arith.mulf %20, %21 : vector<16x128xf32>
    %c0_12 = arith.constant 0 : index
    %c0_13 = arith.constant 0 : index
    %23 = vector.load %arg3[%c0_12, %c0_13] : memref<16x128xf32, #tpu.memory_space<vmem>>, vector<16x128xf32>
    tpu.vector_store %arg3[%c0_12, %c0_13], %22 {strides = array<i32>} : memref<16x128xf32, #tpu.memory_space<vmem>>, vector<16x128xf32>,
    return
  }
  func.func @transform_1(%arg0: i32, %arg1: memref<16xi32, #tpu.memory_space<smem>>) -> (i32, i32) {
    %c0_i32 = arith.constant 0 : i32
    %c0_i32_0 = arith.constant 0 : i32
    return %arg0, %c0_i32 : i32, i32
  }
}

</mosaic_0001>

<bundles_post_ra>
// kernel: tpu_custom_call.1
= control target key start
LH: loop header
LB: loop body
LE: loop exit
PB: predicated region body
PF: predicated region fallthrough
CT: control target
= control target key end

     0   :  { %s500_s9 = smov [#allocation5]   ;;  %s546_s0 = inlined_call_operand.hbm [shape: s32[16], index: 0, kind: input, shape index: {}]   ;;  %s547_s1 = inlined_call_operand.hbm [shape: f32[64,128], index: 1, kind: input, shape index: {}]   ;;  %s548_s2 = inlined_call_operand.hbm [shape: f32[16,128], index: 2, kind: output, shape index: {}]  }
   0x1   :  { %8 = dma.hbm_to_smem %s546_s0, 16, %s500_s9, [#allocation4] }
   0x2   :  { %486 = dma.done.wait [#allocation4], 16 }
   0x3   :  { %487 = vsyncadd [#allocation4], 4294967280 }
   0x4   :  { %10 = sfence }
   0x5   :  { %11 = vsyncpa [#allocation7], 0  ;;  %s523_s12 = smov 0  }
   0x6 LB: > { %s30_s13 = sld [smem:[#allocation5 + %s494_s12]]  ;;  %s33_s14 = scalar_lea.vmem [#allocation2], %s494_s12  ;;  %s494_s12 = sphi %s523_s12, %s29_s12  }
   0x7   : > { %s42_s15 = sshll.u32 %s33_s14, 4  ;;  %s34_s19 = scalar_lea.sflag [#allocation3], %s494_s12  ;;  %s43_s15 = int_to_ptr.vmem [resolvable:$true] %s42_s15 }
   0x8   : > { %s438_s23 = scalar_lea.hbm %s547_s1, 1024 }
   0xc   : > { %s368_s16 = sshll.u32 %s30_s13, 4 }
   0xd   : > { %s32_s18 = scalar_lea.hbm %s547_s1, %s368_s16 }
   0xe   : > { %s436_s20 = scalar_lea.hbm %s32_s18, 16  ;;  %p439_p1 = scmp.lt.s32.totalorder %s32_s18, %s547_s1 }
   0xf   : > { %p437_p0 = scmp.ne.s32.totalorder %s32_s18, %s436_s20  ;;  %p440_p2 = scmp.lt.s32.totalorder %s438_s23, %s436_s20 }
  0x11   : > { %p441_p3 = por %p440_p2, %p439_p1 }
  0x13   : > { %p442_p4 = pnand %p441_p3, %p437_p0 }
  0x15   : > { %445 = shalt.err (!%p442_p4)  }
  0x16   : > { %s446_s26 = scalar_lea.vmem %s43_s15, 16  ;;  %s501_s27 = smov [#allocation2]  }
  0x17   : > { %p447_p5 = scmp.ne.s32.totalorder %s43_s15, %s446_s26  ;;  %s448_s28 = sshll.u32 %s501_s27, 4  ;;  %s449_s28 = int_to_ptr.vmem [resolvable:$false] %s448_s28 }
  0x18   : > { %s450_s29 = scalar_lea.vmem %s449_s28, 512  ;;  %p451_p6 = scmp.lt.s32.totalorder %s43_s15, %s449_s28 }
  0x19   : > { %p452_p7 = scmp.lt.s32.totalorder %s450_s29, %s446_s26 }
  0x1b   : > { %p453_p8 = por %p452_p7, %p451_p6 }
  0x1d   : > { %p454_p9 = pnand %p453_p8, %p447_p5 }
  0x1f   : > { %457 = shalt.err (!%p454_p9)  }
  0x20   : > { %45 = dma.hbm_to_vmem [thread:$0]  %s32_s18, 16, %s43_s15, %s34_s19 }
  0x21   : > { %s29_s12 = sadd.s32 1, %s494_s12  }
  0x22   : > { %p26_p10 = scmp.ge.s32.totalorder %s29_s12, 16  }
  0x23   :  { %s496_s30 = smov (%p26_p10), 0  }
  0x24   :  { %28 = sbr.rel (!%p26_p10) target bundleno = 6 (0x6), region = 96 }
  0x29 LB: > { %s86_s3 = scalar_lea.sflag [#allocation3], %s498_s30  ;;  %s498_s30 = sphi %s496_s30, %s83_s30  }
  0x2a   : > { %488 = dma.done.wait %s86_s3, 16 }
  0x2b   : > { %489 = vsyncadd %s86_s3, 4294967280  ;;  %s83_s30 = sadd.s32 1, %s498_s30  }
  0x2c   : > { %p80_p11 = scmp.ge.s32.totalorder %s83_s30, 16  }
  0x2d   :  { %v91_v0 = vld [vmem:[#allocation2] sm:$0xff] (%p80_p11)  ;;  %v92_v1 = vld [vmem:[#allocation2 + $0x8] sm:$0xff] (%p80_p11)  ;;  %s502_s4 = smov (%p80_p11), [#allocation6]  }
  0x2e   :  { %82 = sbr.rel (!%p80_p11) target bundleno = 41 (0x29), region = 118  ;;  %v93_v2 = vmul.f32 (%p80_p11), 5.656854, %v91_v0  ;;  %v94_v3 = vmul.f32 (%p80_p11), 5.656854, %v92_v1  ;;  %s102_s5 = sshll.u32 (%p80_p11), %s502_s4, 4  ;;  %s103_s5 = int_to_ptr.vmem [resolvable:$true] %s102_s5 }
  0x2f   :  { %s458_s1 = scalar_lea.vmem (%p80_p11), %s103_s5, 256  ;;  %p463_p13 = scmp.lt.s32.totalorder (%p80_p11), %s103_s5, %s103_s5 }
  0x30   :  { %95 = vst [vmem:[#allocation6] sm:$0xff] (%p80_p11), %v93_v2  ;;  %96 = vst [vmem:[#allocation6 + $0x8] sm:$0xff] (%p80_p11), %v94_v3  ;;  %p459_p12 = scmp.ne.s32.totalorder (%p80_p11), %s103_s5, %s458_s1  ;;  %p464_p0 = scmp.lt.s32.totalorder (%p80_p11), %s458_s1, %s458_s1 }
  0x32   :  { %p465_p1 = por (%p80_p11), %p464_p0, %p463_p13 }
  0x34   :  { %p466_p2 = pnand %p465_p1, %p459_p12 }
  0x36   :  { %469 = shalt.err (!%p466_p2)
}
  0x37   :  { %s503_s6 = smov 128   ;;  %s504_s7 = smov 8  }
  0x38   :  { %108 = dma.vmem_to_hbm [thread:$0]  %s103_s5, 256, %s548_s2, [#allocation7], %s503_s6, %s503_s6, %s504_s7  }
  0x39   :  { %490 = dma.done.wait [#allocation7], 256  }
  0x3a   :  { %491 = vsyncadd [#allocation7], 4294967040 }
  0x3b   :  { %112 = vsyncpa [#allocation7], 1 }
  0x3c   :  { %113 = vsyncmov [#allocation3] }
  0x3f   :  { %s114_s10 = vpop.sfrf %113 }
  0x40   :  { %p372_p3 = scmp.ne.s32.totalorder %s114_s10, 0 }
  0x42   :  { %118 = shalt.err (%p372_p3)  }
  0x43   :  { %120 = vsyncmov [#allocation3 + $0x1] }
  0x46   :  { %s121_s11 = vpop.sfrf %120 }
  0x47   :  { %p373_p4 = scmp.ne.s32.totalorder %s121_s11, 0 }
  0x49   :  { %125 = shalt.err (%p373_p4)  }
  0x4a   :  { %127 = vsyncmov [#allocation3 + $0x2] }
  0x4d   :  { %s128_s12 = vpop.sfrf %127 }
  0x4e   :  { %p374_p5 = scmp.ne.s32.totalorder %s128_s12, 0 }
  0x50   :  { %132 = shalt.err (%p374_p5)  }
  0x51   :  { %134 = vsyncmov [#allocation3 + $0x3] }
  0x54   :  { %s135_s13 = vpop.sfrf %134 }
  0x55   :  { %p375_p6 = scmp.ne.s32.totalorder %s135_s13, 0 }
  0x57   :  { %139 = shalt.err (%p375_p6)  }
  0x58   :  { %141 = vsyncmov [#allocation3 + $0x4] }
  0x5b   :  { %s142_s2 = vpop.sfrf %141 }
  0x5c   :  { %p376_p7 = scmp.ne.s32.totalorder %s142_s2, 0 }
  0x5e   :  { %146 = shalt.err (%p376_p7)  }
  0x5f   :  { %148 = vsyncmov [#allocation3 + $0x5] }
  0x62   :  { %s149_s14 = vpop.sfrf %148 }
  0x63   :  { %p377_p8 = scmp.ne.s32.totalorder %s149_s14, 0 }
  0x65   :  { %153 = shalt.err (%p377_p8)  }
  0x66   :  { %155 = vsyncmov [#allocation3 + $0x6] }
  0x69   :  { %s156_s15 = vpop.sfrf %155 }
  0x6a   :  { %p378_p9 = scmp.ne.s32.totalorder %s156_s15, 0 }
  0x6c   :  { %160 = shalt.err (%p378_p9)  }
  0x6d   :  { %162 = vsyncmov [#allocation3 + $0x7] }
  0x70   :  { %s163_s16 = vpop.sfrf %162 }
  0x71   :  { %p379_p10 = scmp.ne.s32.totalorder %s163_s16, 0 }
  0x73   :  { %167 = shalt.err (%p379_p10)  }
  0x74   :  { %169 = vsyncmov [#allocation3 + $0x8] }
  0x77   :  { %s170_s0 = vpop.sfrf %169 }
  0x78   :  { %p380_p11 = scmp.ne.s32.totalorder %s170_s0, 0 }
  0x7a   :  { %174 = shalt.err (%p380_p11)  }
  0x7b   :  { %176 = vsyncmov [#allocation3 + $0x9] }
  0x7e   :  { %s177_s17 = vpop.sfrf %176 }
  0x7f   :  { %p381_p12 = scmp.ne.s32.totalorder %s177_s17, 0 }
  0x81   :  { %181 = shalt.err (%p381_p12)  }
  0x82   :  { %183 = vsyncmov [#allocation3 + $0xa] }
  0x85   :  { %s184_s18 = vpop.sfrf %183 }
  0x86   :  { %p382_p13 = scmp.ne.s32.totalorder %s184_s18, 0 }
  0x88   :  { %188 = shalt.err (%p382_p13)  }
  0x89   :  { %190 = vsyncmov [#allocation3 + $0xb] }
  0x8c   :  { %s191_s19 = vpop.sfrf %190 }
  0x8d   :  { %p383_p0 = scmp.ne.s32.totalorder %s191_s19, 0 }
  0x8f   :  { %195 = shalt.err (%p383_p0)  }
  0x90   :  { %197 = vsyncmov [#allocation3 + $0xc] }
  0x93   :  { %s198_s20 = vpop.sfrf %197 }
  0x94   :  { %p384_p1 = scmp.ne.s32.totalorder %s198_s20, 0 }
  0x96   :  { %202 = shalt.err (%p384_p1)  }
  0x97   :  { %204 = vsyncmov [#allocation3 + $0xd] }
  0x9a   :  { %s205_s21 = vpop.sfrf %204 }
  0x9b   :  { %p385_p2 = scmp.ne.s32.totalorder %s205_s21, 0 }
  0x9d   :  { %209 = shalt.err (%p385_p2)  }
  0x9e   :  { %211 = vsyncmov [#allocation3 + $0xe] }
  0xa1   :  { %s212_s22 = vpop.sfrf %211 }
  0xa2   :  { %p386_p3 = scmp.ne.s32.totalorder %s212_s22, 0 }
  0xa4   :  { %216 = shalt.err (%p386_p3)  }
  0xa5   :  { %218 = vsyncmov [#allocation3 + $0xf] }
  0xa8   :  { %s219_s23 = vpop.sfrf %218 }
  0xa9   :  { %p387_p4 = scmp.ne.s32.totalorder %s219_s23, 0 }
  0xab   :  { %223 = shalt.err (%p387_p4)  }
  0xac   :  { %225 = vsyncmov [#allocation3 + $0x10] }
  0xaf   :  { %s226_s24 = vpop.sfrf %225 }
  0xb0   :  { %p388_p5 = scmp.ne.s32.totalorder %s226_s24, 0 }
  0xb2   :  { %230 = shalt.err (%p388_p5)  }
  0xb3   :  { %232 = vsyncmov [#allocation3 + $0x11] }
  0xb6   :  { %s233_s25 = vpop.sfrf %232 }
  0xb7   :  { %p389_p6 = scmp.ne.s32.totalorder %s233_s25, 0 }
  0xb9   :  { %237 = shalt.err (%p389_p6)  }
  0xba   :  { %239 = vsyncmov [#allocation3 + $0x12] }
  0xbd   :  { %s240_s26 = vpop.sfrf %239 }
  0xbe   :  { %p390_p7 = scmp.ne.s32.totalorder %s240_s26, 0 }
  0xc0   :  { %244 = shalt.err (%p390_p7)  }
  0xc1   :  { %246 = vsyncmov [#allocation3 + $0x13] }
  0xc4   :  { %s247_s27 = vpop.sfrf %246 }
  0xc5   :  { %p391_p8 = scmp.ne.s32.totalorder %s247_s27, 0 }
  0xc7   :  { %251 = shalt.err (%p391_p8)  }
  0xc8   :  { %253 = vsyncmov [#allocation3 + $0x14] }
  0xcb   :  { %s254_s28 = vpop.sfrf %253 }
  0xcc   :  { %p392_p9 = scmp.ne.s32.totalorder %s254_s28, 0 }
  0xce   :  { %258 = shalt.err (%p392_p9)  }
  0xcf   :  { %260 = vsyncmov [#allocation3 + $0x15] }
  0xd2   :  { %s261_s29 = vpop.sfrf %260 }
  0xd3   :  { %p393_p10 = scmp.ne.s32.totalorder %s261_s29, 0 }
  0xd5   :  { %265 = shalt.err (%p393_p10)  }
  0xd6   :  { %267 = vsyncmov [#allocation3 + $0x16] }
  0xd9   :  { %s268_s30 = vpop.sfrf %267 }
  0xda   :  { %p394_p11 = scmp.ne.s32.totalorder %s268_s30, 0 }
  0xdc   :  { %272 = shalt.err (%p394_p11)  }
  0xdd   :  { %274 = vsyncmov [#allocation3 + $0x17] }
  0xe0   :  { %s275_s3 = vpop.sfrf %274 }
  0xe1   :  { %p395_p12 = scmp.ne.s32.totalorder %s275_s3, 0 }
  0xe3   :  { %279 = shalt.err (%p395_p12)  }
  0xe4   :  { %281 = vsyncmov [#allocation3 + $0x18] }
  0xe7   :  { %s282_s4 = vpop.sfrf %281 }
  0xe8   :  { %p396_p13 = scmp.ne.s32.totalorder %s282_s4, 0 }
  0xea   :  { %286 = shalt.err (%p396_p13)  }
  0xeb   :  { %288 = vsyncmov [#allocation3 + $0x19] }
  0xee   :  { %s289_s5 = vpop.sfrf %288 }
  0xef   :  { %p397_p0 = scmp.ne.s32.totalorder %s289_s5, 0 }
  0xf1   :  { %293 = shalt.err (%p397_p0)  }
  0xf2   :  { %295 = vsyncmov [#allocation3 + $0x1a] }
  0xf5   :  { %s296_s1 = vpop.sfrf %295 }
  0xf6   :  { %p398_p1 = scmp.ne.s32.totalorder %s296_s1, 0 }
  0xf8   :  { %300 = shalt.err (%p398_p1)  }
  0xf9   :  { %302 = vsyncmov [#allocation3 + $0x1b] }
  0xfc   :  { %s303_s6 = vpop.sfrf %302 }
  0xfd   :  { %p399_p2 = scmp.ne.s32.totalorder %s303_s6, 0 }
  0xff   :  { %307 = shalt.err (%p399_p2)  }
 0x100   :  { %309 = vsyncmov [#allocation3 + $0x1c] }
 0x103   :  { %s310_s7 = vpop.sfrf %309 }
 0x104   :  { %p400_p3 = scmp.ne.s32.totalorder %s310_s7, 0 }
 0x106   :  { %314 = shalt.err (%p400_p3)  }
 0x107   :  { %316 = vsyncmov [#allocation3 + $0x1d] }
 0x10a   :  { %s317_s8 = vpop.sfrf %316 }
 0x10b   :  { %p401_p4 = scmp.ne.s32.totalorder %s317_s8, 0 }
 0x10d   :  { %321 = shalt.err (%p401_p4)  }
 0x10e   :  { %323 = vsyncmov [#allocation3 + $0x1e] }
 0x111   :  { %s324_s9 = vpop.sfrf %323 }
 0x112   :  { %p402_p5 = scmp.ne.s32.totalorder %s324_s9, 0 }
 0x114   :  { %328 = shalt.err (%p402_p5)  }
 0x115   :  { %330 = vsyncmov [#allocation3 + $0x1f] }
 0x118   :  { %s331_s10 = vpop.sfrf %330 }
 0x119   :  { %p403_p6 = scmp.ne.s32.totalorder %s331_s10, 0 }
 0x11b   :  { %335 = shalt.err (%p403_p6)  }

</bundles_post_ra>
